<compile_context>
chip_gen: v5e
topology: v5e:2x2
jax: 0.10.0
libtpu: 0.0.40
codegen_flags: <defaults>
</compile_context>

<pallas_src>
import jax
import jax.numpy as jnp
from jax.experimental import pallas as pl
from jax.experimental.pallas import tpu as pltpu


def _round_up(x: int, m: int) -> int:
    return (x + m - 1) // m * m


def pinet_kernel(x_ref, w_ref, b_ref, o_ref):
    # x: (TB, F) activation tile (streamed, double-buffered)
    # w: (F, A)  weight, pre-transposed to the MXU-native layout (resident)
    # b: (1, A)  bias (resident)
    y = jnp.dot(x_ref[...], w_ref[...], preferred_element_type=jnp.float32)
    o_ref[...] = (y + b_ref[...]).astype(o_ref.dtype)


def _pick_batch_tile(batch: int, sublane: int) -> int:
    """Batch tile: sublane-aligned; >=2 grid points for mid/large batches."""
    tb_max = 512  # ~85% of HBM roofline per the tiling sweep (vs ~63% at 256)
    if batch <= sublane:
        return batch  # full-dim block, grid = (1,)
    half = _round_up(pl.cdiv(batch, 2), sublane)
    return min(tb_max, half)


def pinet_forward(feature, weight, bias):
    """feature: (B, F); weight: (A, F) (PyTorch nn.Linear layout); bias: (A,)."""
    B, F = feature.shape
    A, F_w = weight.shape
    assert F == F_w and bias.shape == (A,)

    # One cheap XLA transpose of the small weight, done once outside the kernel,
    # so the in-kernel dot is the MXU-native (M,K)x(K,N) contraction.
    w_t = weight.T.astype(feature.dtype)             # (F, A)
    b2 = bias.reshape(1, A).astype(feature.dtype)    # (1, A)

    itemsize = jnp.dtype(feature.dtype).itemsize
    sublane = 8 * (4 // itemsize) if itemsize in (1, 2, 4) else 8

    TB = _pick_batch_tile(B, sublane)
    grid = (pl.cdiv(B, TB),)   # a partial last tile is fine: rows are independent
                               # and out-of-bounds output rows are masked on store

    # VMEM budget: resident W + b (x2 if the Buffered(1) fallback is taken) plus
    # double-buffered streamed x / out tiles; never below the 32 MiB default.
    resident = (F * A + A) * itemsize
    streamed = 2 * TB * (F + A) * itemsize
    vmem_limit = int(min(max(2 * (resident + streamed), 32 << 20), 64 << 20))
    # TODO(synk): for very large feature/act dims (resident W exceeding the VMEM
    # budget) add a K-reduction grid axis ("arbitrary", last) with an f32
    # accumulator scratch instead of keeping W fully resident.

    out_shape = jax.ShapeDtypeStruct((B, A), feature.dtype)
    out_spec = pl.BlockSpec((TB, A), lambda i: (i, 0))      # full A: no post-slice
    x_spec = pl.BlockSpec((TB, F), lambda i: (i, 0))        # full F: no pad of x
    params = pltpu.CompilerParams(
        dimension_semantics=("parallel",),
        vmem_limit_bytes=vmem_limit,
    )

    def run(single_buffer_resident: bool):
        kw = dict(pipeline_mode=pl.Buffered(1)) if single_buffer_resident else {}
        in_specs = [
            x_spec,                                          # streamed x tiles
            pl.BlockSpec((F, A), lambda i: (0, 0), **kw),    # resident W
            pl.BlockSpec((1, A), lambda i: (0, 0), **kw),    # resident b
        ]
        return pl.pallas_call(
            pinet_kernel,
            out_shape=out_shape,
            grid=grid,
            in_specs=in_specs,
            out_specs=out_spec,
            compiler_params=params,
        )(feature, w_t, b2)

    try:
        # Constant-index resident blocks only need one buffer; halves W's VMEM
        # footprint (matters most on v7x's 64 MiB VMEM, also helps v5e).
        return run(True)
    except Exception:
        # Some JAX builds may not accept Buffered(1) on the outer pipeline;
        # default double buffering is still correct.
        return run(False)


if __name__ == "__main__":
    # Small shapes implied by the module: feature (batch, feature_dim).
    batch, feature_dim, act_dim = 8, 32, 8

    key = jax.random.PRNGKey(0)
    k_x, k_w, k_b = jax.random.split(key, 3)

    # Synthetic parameters in PyTorch nn.Linear layout:
    #   weight: (act_dim, feature_dim), bias: (act_dim,)
    bound = 1.0 / (feature_dim ** 0.5)
    weight = jax.random.uniform(k_w, (act_dim, feature_dim),
                                minval=-bound, maxval=bound, dtype=jnp.float32)
    bias = jax.random.uniform(k_b, (act_dim,),
                              minval=-bound, maxval=bound, dtype=jnp.float32)
    feature = jax.random.normal(k_x, (batch, feature_dim), dtype=jnp.float32)

    out = jax.block_until_ready(pinet_forward(feature, weight, bias))

    # Pure-JAX reference (same semantics as torch.nn.Linear).
    ref = feature @ weight.T + bias
    assert out.shape == (batch, act_dim)
    assert jnp.allclose(out, ref, atol=1e-5, rtol=1e-5), "mismatch vs reference"

    print("KERNEL_OK")
</pallas_src>

<mosaic_0001>
module attributes {stable_mosaic.version = 11 : i64} {
  func.func @pinet_kernel(%arg0: i32, %arg1: memref<8x32xf32, #tpu.memory_space<vmem>>, %arg2: memref<32x8xf32, #tpu.memory_space<vmem>>, %arg3: memref<1x8xf32, #tpu.memory_space<vmem>>, %arg4: memref<8x8xf32, #tpu.memory_space<vmem>>) attributes {dimension_semantics = [#tpu.dimension_semantics<parallel>], iteration_bounds = array<i64: 1>, scalar_prefetch = 0 : i64, scratch_operands = 0 : i64, tpu.core_type = #tpu.core_type<tc>, window_params = [{transform_indices = @transform_0, window_bounds = array<i64: 8, 32>}, {pipeline_mode = #tpu.pipeline_mode<synchronous>, transform_indices = @transform_1, window_bounds = array<i64: 32, 8>}, {pipeline_mode = #tpu.pipeline_mode<synchronous>, transform_indices = @transform_2, window_bounds = array<i64: 1, 8>}, {transform_indices = @transform_3, window_bounds = array<i64: 8, 8>}]} {
    %c0 = arith.constant 0 : index
    %c0_0 = arith.constant 0 : index
    %0 = vector.load %arg1[%c0, %c0_0] : memref<8x32xf32, #tpu.memory_space<vmem>>, vector<8x32xf32>
    %c0_1 = arith.constant 0 : index
    %c0_2 = arith.constant 0 : index
    %1 = vector.load %arg2[%c0_1, %c0_2] : memref<32x8xf32, #tpu.memory_space<vmem>>, vector<32x8xf32>
    %cst = arith.constant dense<0.000000e+00> : vector<8x8xf32>
    %2 = tpu.matmul %0, %1, %cst {dimension_numbers = #tpu.dot_dimension_numbers<[1], [0], [0], [1], [0, 0, 1, 1], [], []>} : vector<8x32xf32>, vector<32x8xf32>, vector<8x8xf32> -> vector<8x8xf32>
    %c0_3 = arith.constant 0 : index
    %c0_4 = arith.constant 0 : index
    %3 = vector.load %arg3[%c0_3, %c0_4] : memref<1x8xf32, #tpu.memory_space<vmem>>, vector<1x8xf32>
    %4 = vector.broadcast %3 : vector<1x8xf32> to vector<8x8xf32>
    %5 = arith.addf %2, %4 : vector<8x8xf32>
    %c0_5 = arith.constant 0 : index
    %c0_6 = arith.constant 0 : index
    %6 = vector.load %arg4[%c0_5, %c0_6] : memref<8x8xf32, #tpu.memory_space<vmem>>, vector<8x8xf32>
    tpu.vector_store %arg4[%c0_5, %c0_6], %5 {strides = array<i32>} : memref<8x8xf32, #tpu.memory_space<vmem>>, vector<8x8xf32>,
    return
  }
  func.func @transform_0(%arg0: i32) -> (i32, i32) {
    %c0_i32 = arith.constant 0 : i32
    %c0_i32_0 = arith.constant 0 : i32
    return %arg0, %c0_i32 : i32, i32
  }
  func.func @transform_1(%arg0: i32) -> (i32, i32) {
    %c0_i32 = arith.constant 0 : i32
    %c0_i32_0 = arith.constant 0 : i32
    %c0_i32_1 = arith.constant 0 : i32
    return %c0_i32, %c0_i32_0 : i32, i32
  }
  func.func @transform_2(%arg0: i32) -> (i32, i32) {
    %c0_i32 = arith.constant 0 : i32
    %c0_i32_0 = arith.constant 0 : i32
    %c0_i32_1 = arith.constant 0 : i32
    return %c0_i32, %c0_i32_0 : i32, i32
  }
  func.func @transform_3(%arg0: i32) -> (i32, i32) {
    %c0_i32 = arith.constant 0 : i32
    %c0_i32_0 = arith.constant 0 : i32
    return %arg0, %c0_i32 : i32, i32
  }
}

module attributes {stable_mosaic.version = 11 : i64} {
  func.func @pinet_kernel(%arg0: i32, %arg1: memref<8x32xf32, #tpu.memory_space<vmem>>, %arg2: memref<32x8xf32, #tpu.memory_space<vmem>>, %arg3: memref<1x8xf32, #tpu.memory_space<vmem>>, %arg4: memref<8x8xf32, #tpu.memory_space<vmem>>) attributes {dimension_semantics = [#tpu.dimension_semantics<parallel>], iteration_bounds = array<i64: 1>, scalar_prefetch = 0 : i64, scratch_operands = 0 : i64, tpu.core_type = #tpu.core_type<tc>, window_params = [{transform_indices = @transform_0, window_bounds = array<i64: 8, 32>}, {pipeline_mode = #tpu.pipeline_mode<synchronous>, transform_indices = @transform_1, window_bounds = array<i64: 32, 8>}, {pipeline_mode = #tpu.pipeline_mode<synchronous>, transform_indices = @transform_2, window_bounds = array<i64: 1, 8>}, {transform_indices = @transform_3, window_bounds = array<i64: 8, 8>}]} {
    %c0 = arith.constant 0 : index
    %c0_0 = arith.constant 0 : index
    %0 = vector.load %arg1[%c0, %c0_0] : memref<8x32xf32, #tpu.memory_space<vmem>>, vector<8x32xf32>
    %c0_1 = arith.constant 0 : index
    %c0_2 = arith.constant 0 : index
    %1 = vector.load %arg2[%c0_1, %c0_2] : memref<32x8xf32, #tpu.memory_space<vmem>>, vector<32x8xf32>
    %cst = arith.constant dense<0.000000e+00> : vector<8x8xf32>
    %2 = tpu.matmul %0, %1, %cst {dimension_numbers = #tpu.dot_dimension_numbers<[1], [0], [0], [1], [0, 0, 1, 1], [], []>} : vector<8x32xf32>, vector<32x8xf32>, vector<8x8xf32> -> vector<8x8xf32>
    %c0_3 = arith.constant 0 : index
    %c0_4 = arith.constant 0 : index
    %3 = vector.load %arg3[%c0_3, %c0_4] : memref<1x8xf32, #tpu.memory_space<vmem>>, vector<1x8xf32>
    %4 = vector.broadcast %3 : vector<1x8xf32> to vector<8x8xf32>
    %5 = arith.addf %2, %4 : vector<8x8xf32>
    %c0_5 = arith.constant 0 : index
    %c0_6 = arith.constant 0 : index
    %6 = vector.load %arg4[%c0_5, %c0_6] : memref<8x8xf32, #tpu.memory_space<vmem>>, vector<8x8xf32>
    tpu.vector_store %arg4[%c0_5, %c0_6], %5 {strides = array<i32>} : memref<8x8xf32, #tpu.memory_space<vmem>>, vector<8x8xf32>,
    return
  }
  func.func @transform_0(%arg0: i32) -> (i32, i32) {
    %c0_i32 = arith.constant 0 : i32
    %c0_i32_0 = arith.constant 0 : i32
    return %arg0, %c0_i32 : i32, i32
  }
  func.func @transform_1(%arg0: i32) -> (i32, i32) {
    %c0_i32 = arith.constant 0 : i32
    %c0_i32_0 = arith.constant 0 : i32
    %c0_i32_1 = arith.constant 0 : i32
    return %c0_i32, %c0_i32_0 : i32, i32
  }
  func.func @transform_2(%arg0: i32) -> (i32, i32) {
    %c0_i32 = arith.constant 0 : i32
    %c0_i32_0 = arith.constant 0 : i32
    %c0_i32_1 = arith.constant 0 : i32
    return %c0_i32, %c0_i32_0 : i32, i32
  }
  func.func @transform_3(%arg0: i32) -> (i32, i32) {
    %c0_i32 = arith.constant 0 : i32
    %c0_i32_0 = arith.constant 0 : i32
    return %arg0, %c0_i32 : i32, i32
  }
}

</mosaic_0001>

<bundles_post_ra>
// kernel: tpu_custom_call.1
= control target key start
LH: loop header
LB: loop body
LE: loop exit
PB: predicated region body
PF: predicated region fallthrough
CT: control target
= control target key end

     0   :  { %s137_s0 = inlined_call_operand.vmem [shape: f32[8,32], index: 0, kind: input, shape index: {}]   ;;  %s138_s1 = inlined_call_operand.vmem [shape: f32[32,8], index: 1, kind: input, shape index: {}]   ;;  %s139_s2 = inlined_call_operand.vmem [shape: f32[1,8], index: 2, kind: input, shape index: {}]   ;;  %s140_s3 = inlined_call_operand.hbm [shape: f32[8,8], index: 3, kind: output, shape index: {}]  }
   0x1   :  { %v19_v0 = vld [vmem:[%s138_s1 + $0x18] sm:$0xff]  ;;  %v18_v1 = vld [vmem:[%s138_s1 + $0x10] sm:$0xff]  ;;  %v17_v2 = vld [vmem:[%s138_s1 + $0x8] sm:$0xff] }
   0x2   :  { %40 = vmatpush.msra.mxu0 %v19_v0 }
   0x3   :  { %8 = vsyncpa [#allocation3], 0  ;;  %v16_v3 = vld [vmem:[%s138_s1] sm:$0xff]  ;;  %vm24_vm0 = vcmask 261120   ;;  %s95_s24 = smov [#allocation2]   ;;  %s57_s28 = sshll.u32 %s140_s3, 4  ;;  %s58_s28 = int_to_ptr.hbm [resolvable:$true] %s57_s28 }
   0x4   :  { %41 = vmatpush.msra.mxu0 %v18_v1  ;;  %v15_v4 = vld [vmem:[%s137_s0] sm:$0xff]  ;;  %s55_s25 = sshll.u32 %s95_s24, 4  ;;  %vm48_vm1 = vcmask 64512   ;;  %s56_s25 = int_to_ptr.vmem [resolvable:$true] %s55_s25 }
   0x5   :  { %v68_v5 = vld [vmem:[%s139_s2] ss:$0 sm:$0xff] }
   0x6   :  { %42 = vmatpush.msra.mxu0 %v17_v2 }
   0x8   :  { %43 = vmatpush.msra.mxu0 %v16_v3 }
   0x9   :  { %66 = vmatmul.msk.f32.vlgmr.msra.gmra.mxu0 %vm24_vm0, %v15_v4 }
  0x86   :  { %v45_v6 = vpop.f32.mrf.mxu0 }
  0x87   :  { %v46_v7 = vadd.f32 %v68_v5, %v45_v6 }
  0x89   :  { %49 = vst.msk [vmem:[#allocation2] sm:$0xff] %vm48_vm1, %v46_v7 }
  0x8a   :  { %60 = dma.vmem_to_hbm [thread:$0]  %s56_s25, 128, %s58_s28, [#allocation3]  }
  0x8b   :  { %93 = dma.done.wait [#allocation3], 128  }
  0x8c   :  { %94 = vsyncadd [#allocation3], 4294967168 }
  0x8d   :  { %65 = vsyncpa [#allocation3], 1 }

// kernel: tpu_custom_call.1
= control target key start
LH: loop header
LB: loop body
LE: loop exit
PB: predicated region body
PF: predicated region fallthrough
CT: control target
= control target key end

     0   :  { %s137_s0 = inlined_call_operand.vmem [shape: f32[8,32], index: 0, kind: input, shape index: {}]   ;;  %s138_s1 = inlined_call_operand.vmem [shape: f32[32,8], index: 1, kind: input, shape index: {}]   ;;  %s139_s2 = inlined_call_operand.vmem [shape: f32[1,8], index: 2, kind: input, shape index: {}]   ;;  %s140_s3 = inlined_call_operand.hbm [shape: f32[8,8], index: 3, kind: output, shape index: {}]  }
   0x1   :  { %v19_v0 = vld [vmem:[%s138_s1 + $0x18] sm:$0xff]  ;;  %v18_v1 = vld [vmem:[%s138_s1 + $0x10] sm:$0xff]  ;;  %v17_v2 = vld [vmem:[%s138_s1 + $0x8] sm:$0xff] }
   0x2   :  { %40 = vmatpush.msra.mxu0 %v19_v0 }
   0x3   :  { %8 = vsyncpa [#allocation3], 0  ;;  %v16_v3 = vld [vmem:[%s138_s1] sm:$0xff]  ;;  %vm24_vm0 = vcmask 261120   ;;  %s95_s24 = smov [#allocation2]   ;;  %s57_s28 = sshll.u32 %s140_s3, 4  ;;  %s58_s28 = int_to_ptr.hbm [resolvable:$true] %s57_s28 }
   0x4   :  { %41 = vmatpush.msra.mxu0 %v18_v1  ;;  %v15_v4 = vld [vmem:[%s137_s0] sm:$0xff]  ;;  %s55_s25 = sshll.u32 %s95_s24, 4  ;;  %vm48_vm1 = vcmask 64512   ;;  %s56_s25 = int_to_ptr.vmem [resolvable:$true] %s55_s25 }
   0x5   :  { %v68_v5 = vld [vmem:[%s139_s2] ss:$0 sm:$0xff] }
   0x6   :  { %42 = vmatpush.msra.mxu0 %v17_v2 }
   0x8   :  { %43 = vmatpush.msra.mxu0 %v16_v3 }
   0x9   :  { %66 = vmatmul.msk.f32.vlgmr.msra.gmra.mxu0 %vm24_vm0, %v15_v4 }
  0x86   :  { %v45_v6 = vpop.f32.mrf.mxu0 }
  0x87   :  { %v46_v7 = vadd.f32 %v68_v5, %v45_v6 }
  0x89   :  { %49 = vst.msk [vmem:[#allocation2] sm:$0xff] %vm48_vm1, %v46_v7 }
  0x8a   :  { %60 = dma.vmem_to_hbm [thread:$0]  %s56_s25, 128, %s58_s28, [#allocation3]  }
  0x8b   :  { %93 = dma.done.wait [#allocation3], 128  }
  0x8c   :  { %94 = vsyncadd [#allocation3], 4294967168 }
  0x8d   :  { %65 = vsyncpa [#allocation3], 1 }

</bundles_post_ra>
